<compile_context>
chip_gen: v5e
topology: v5e:2x2
jax: 0.10.0
libtpu: 0.0.40
codegen_flags: <defaults>
</compile_context>

<pallas_src>
import functools

import jax
import jax.numpy as jnp
from jax import lax
from jax.experimental import pallas as pl
from jax.experimental.pallas import tpu as pltpu


def _round_up(x, m):
    return (x + m - 1) // m * m


def _biased_dot_kernel(lp_ref, rp_ref, ln_ref, rn_ref,
                       pos_ref, lneg_ref, rneg_ref, *, matmul_dtype):
    """One grid step = (Cb chunks) x (Pt positive rows), full feature dim D."""
    lp = lp_ref[...]          # (Cb, Pt, D)
    rp = rp_ref[...]          # (Cb, Pt, D)
    ln = ln_ref[...]          # (Cb, L,  D)
    rn = rn_ref[...]          # (Cb, R,  D)
    D = lp.shape[-1]

    # (1,1,D) mask: 0 on the bias lane, 1 on embedding lanes.  Built at (1,1,D)
    # (not full size) and broadcast by the VPU; reused for both positives.
    lane = lax.broadcasted_iota(jnp.int32, (1, 1, D), 2)
    emb_mask = (lane != 0).astype(lp.dtype)

    lp0 = lp * emb_mask       # bias lane zeroed -> biases never enter the MXU
    rp0 = rp * emb_mask

    # Biases, kept in f32 regardless of matmul_dtype.
    lp_b = lp[..., 0].astype(jnp.float32)     # (Cb, Pt)
    rp_b = rp[..., 0].astype(jnp.float32)     # (Cb, Pt)
    ln_b = ln[..., 0].astype(jnp.float32)     # (Cb, L)
    rn_b = rn[..., 0].astype(jnp.float32)     # (Cb, R)

    # Positive scores: elementwise f32 path (VPU + XLU reduce).
    pos = (jnp.sum(lp0.astype(jnp.float32) * rp0.astype(jnp.float32), axis=-1)
           + lp_b + rp_b)                                    # (Cb, Pt)
    pos_ref[...] = pos[:, None, :].astype(pos_ref.dtype)     # lane-dense (Cb,1,Pt)

    # Batched NT matmuls: contract last dims, batch over the chunk dim (no .T).
    def mm(a, b):
        if matmul_dtype is not None:
            a = a.astype(matmul_dtype)
            b = b.astype(matmul_dtype)
        return lax.dot_general(a, b,
                               dimension_numbers=(((2,), (2,)), ((0,), (0,))),
                               preferred_element_type=jnp.float32)

    lneg = mm(rp0, ln) + rp_b[..., None] + ln_b[:, None, :]  # (Cb, Pt, L) f32
    lneg_ref[...] = lneg.astype(lneg_ref.dtype)

    rneg = mm(lp0, rn) + lp_b[..., None] + rn_b[:, None, :]  # (Cb, Pt, R) f32
    rneg_ref[...] = rneg.astype(rneg_ref.dtype)


def biased_dot_comparator(lhs_pos, rhs_pos, lhs_neg, rhs_neg, *,
                          matmul_dtype=jnp.bfloat16,
                          neg_scores_dtype=jnp.bfloat16,
                          max_chunks_per_step=None):
    """BiasedComparator(DotComparator()).forward in Pallas.

    Performance guidance:
      * matmul_dtype=bfloat16 (default) drives the MXU natively on v5e/v6e/v7x;
        biases are added in f32 outside the MXU path.  Pass matmul_dtype=None
        for full-precision matmuls.
      * lneg/rneg default to bfloat16 outputs (the kernel is write-bandwidth
        bound); pass neg_scores_dtype=jnp.float32 if the loss needs f32 scores.
      * Pass bfloat16 HBM inputs when available: halves input DMA traffic.
      * Prefer per-chunk P >= 128 (v5e MXU) / 256 (v6e/v7x); small P leaves most
        MXU rows idle no matter how many chunks are batched per grid step.
      * If L/R are multiples of 128 the negative-score stores are fully
        lane-dense; otherwise only the tail store is masked (no wrapper-side
        pad/slice HBM passes are performed either way).
    """
    C, P, D = lhs_pos.shape
    assert rhs_pos.shape == (C, P, D)
    L = lhs_neg.shape[1]
    R = rhs_neg.shape[1]
    assert lhs_neg.shape == (C, L, D) and rhs_neg.shape == (C, R, D)

    in_isz = jnp.dtype(lhs_pos.dtype).itemsize
    mm_isz = in_isz if matmul_dtype is None else jnp.dtype(matmul_dtype).itemsize
    neg_isz = jnp.dtype(neg_scores_dtype).itemsize

    # Generation-aware VMEM budget (v7x: 64 MiB/core, v5e/v6e: 128 MiB).
    try:
        vmem_cap = int(pltpu.get_tpu_info().vmem_capacity_bytes)
    except Exception:
        vmem_cap = 64 * 1024 * 1024          # conservative fallback (v7x per core)
    tile_budget = min(int(0.42 * vmem_cap), 56 << 20)

    def tile_bytes(b, r, c, isz):            # tile padded to (8, 128)
        return b * _round_up(max(r, 1), 8) * _round_up(max(c, 1), 128) * isz

    def step_bytes(cb, pt):
        # Pallas-managed pipeline tiles (double-buffered): inputs + outputs.
        pipe = 2 * (2 * tile_bytes(cb, pt, D, in_isz)        # lhs_pos, rhs_pos
                    + tile_bytes(cb, L, D, in_isz)           # lhs_neg
                    + tile_bytes(cb, R, D, in_isz)           # rhs_neg
                    + tile_bytes(cb, 1, pt, 4)               # pos (f32)
                    + tile_bytes(cb, pt, L, neg_isz)         # lneg
                    + tile_bytes(cb, pt, R, neg_isz))        # rneg
        # In-kernel temporaries: masked/cast operand copies + f32 matmul results.
        tmp = (2 * tile_bytes(cb, pt, D, in_isz)
               + 2 * tile_bytes(cb, pt, D, mm_isz)
               + tile_bytes(cb, L, D, mm_isz) + tile_bytes(cb, R, D, mm_isz)
               + tile_bytes(cb, pt, L, 4) + tile_bytes(cb, pt, R, 4))
        return pipe + tmp

    # Chunk (C) tiling: cap at ceil(C/2) so the grid has >= 2 steps whenever
    # C >= 2 (both v7x TensorCores get work with dimension_semantics=parallel).
    cap_c = C if C < 2 else pl.cdiv(C, 2)
    if max_chunks_per_step is not None:
        cap_c = max(1, min(cap_c, max_chunks_per_step))

    Pt = P
    Cb = None
    for cb in range(cap_c, 0, -1):
        if step_bytes(cb, P) <= tile_budget:
            Cb = cb
            break
    if Cb is None:
        # Even a single chunk does not fit: tile the P (query-row) axis to a
        # multiple of 128 (keeps pos output lane-dense and MXU rows full).
        Cb = 1
        if P > 128:
            Pt = 128
            for k in range(P // 128, 0, -1):
                if step_bytes(1, k * 128) <= tile_budget:
                    Pt = k * 128
                    break
        # TODO(synk): for huge L/R with tiny P an additional L/R grid axis
        # would be needed; not implemented.
    else:
        # Prefer a divisor of C close to the budget-limited Cb (avoids a ragged
        # last step) but never collapse to tiny chunks for awkward (prime) C.
        lo = max(1, (3 * Cb + 3) // 4)
        for cb in range(Cb, lo - 1, -1):
            if C % cb == 0:
                Cb = cb
                break

    grid = (pl.cdiv(C, Cb), pl.cdiv(P, Pt))

    needed = step_bytes(Cb, Pt)
    vmem_limit = min(max(32 << 20, needed + (8 << 20)), int(0.92 * vmem_cap))

    kernel = functools.partial(_biased_dot_kernel, matmul_dtype=matmul_dtype)

    pos3, lneg, rneg = pl.pallas_call(
        kernel,
        out_shape=(
            jax.ShapeDtypeStruct((C, 1, P), jnp.float32),
            jax.ShapeDtypeStruct((C, P, L), neg_scores_dtype),
            jax.ShapeDtypeStruct((C, P, R), neg_scores_dtype),
        ),
        grid_spec=pltpu.PrefetchScalarGridSpec(
            num_scalar_prefetch=0,
            grid=grid,
            in_specs=[
                pl.BlockSpec((Cb, Pt, D), lambda c, p: (c, p, 0)),   # lhs_pos
                pl.BlockSpec((Cb, Pt, D), lambda c, p: (c, p, 0)),   # rhs_pos
                pl.BlockSpec((Cb, L, D), lambda c, p: (c, 0, 0)),    # lhs_neg
                pl.BlockSpec((Cb, R, D), lambda c, p: (c, 0, 0)),    # rhs_neg
            ],
            out_specs=[
                pl.BlockSpec((Cb, 1, Pt), lambda c, p: (c, 0, p)),   # pos
                pl.BlockSpec((Cb, Pt, L), lambda c, p: (c, p, 0)),   # lneg
                pl.BlockSpec((Cb, Pt, R), lambda c, p: (c, p, 0)),   # rneg
            ],
        ),
        compiler_params=pltpu.CompilerParams(
            dimension_semantics=("parallel", "parallel"),
            vmem_limit_bytes=int(vmem_limit)),
    )(lhs_pos, rhs_pos, lhs_neg, rhs_neg)

    return pos3[:, 0, :], lneg, rneg


def _reference(lhs_pos, rhs_pos, lhs_neg, rhs_neg, matmul_dtype=None):
    """Pure-JAX reference; embeddings optionally cast to matmul_dtype to mirror
    the kernel's MXU numerics (biases stay f32)."""
    def emb(x):
        e = x[..., 1:]
        return e if matmul_dtype is None else e.astype(matmul_dtype)

    pos = (jnp.sum(lhs_pos[..., 1:] * rhs_pos[..., 1:], axis=-1)
           + lhs_pos[..., 0] + rhs_pos[..., 0])
    lneg = (jnp.einsum("cpd,cld->cpl", emb(rhs_pos), emb(lhs_neg),
                       preferred_element_type=jnp.float32)
            + rhs_pos[..., 0][..., None] + lhs_neg[..., 0][:, None, :])
    rneg = (jnp.einsum("cpd,crd->cpr", emb(lhs_pos), emb(rhs_neg),
                       preferred_element_type=jnp.float32)
            + lhs_pos[..., 0][..., None] + rhs_neg[..., 0][:, None, :])
    return pos, lneg, rneg


if __name__ == "__main__":
    key = jax.random.PRNGKey(0)
    k1, k2, k3, k4 = jax.random.split(key, 4)
    C, P, L, R, D = 4, 8, 19, 16, 33   # D = 1 bias + 32 embedding dims

    lhs_pos = jax.random.normal(k1, (C, P, D), dtype=jnp.float32)
    rhs_pos = jax.random.normal(k2, (C, P, D), dtype=jnp.float32)
    lhs_neg = jax.random.normal(k3, (C, L, D), dtype=jnp.float32)
    rhs_neg = jax.random.normal(k4, (C, R, D), dtype=jnp.float32)

    # Divisible chunk count: grid = (2, 1), two chunks per step.
    pos, lneg, rneg = biased_dot_comparator(
        lhs_pos, rhs_pos, lhs_neg, rhs_neg, max_chunks_per_step=2)
    jax.block_until_ready((pos, lneg, rneg))

    pos_r, lneg_r, rneg_r = _reference(lhs_pos, rhs_pos, lhs_neg, rhs_neg,
                                       matmul_dtype=jnp.bfloat16)
    assert pos.shape == (C, P) and lneg.shape == (C, P, L) and rneg.shape == (C, P, R)
    assert pos.dtype == jnp.float32
    assert lneg.dtype == jnp.bfloat16 and rneg.dtype == jnp.bfloat16
    assert jnp.allclose(pos, pos_r, atol=1e-4, rtol=1e-4)
    assert jnp.allclose(lneg.astype(jnp.float32), lneg_r, atol=1e-2, rtol=1e-2)
    assert jnp.allclose(rneg.astype(jnp.float32), rneg_r, atol=1e-2, rtol=1e-2)

    # Ragged chunk count (C not divisible by the chunk batch): grid uses cdiv,
    # the last step's out-of-bounds rows are masked on writeback by Pallas.
    C2 = 3
    lp2, rp2 = lhs_pos[:C2], rhs_pos[:C2]
    ln2, rn2 = lhs_neg[:C2], rhs_neg[:C2]
    pos2, lneg2, rneg2 = biased_dot_comparator(
        lp2, rp2, ln2, rn2, max_chunks_per_step=2)
    jax.block_until_ready((pos2, lneg2, rneg2))
    pr2, lr2, rr2 = _reference(lp2, rp2, ln2, rn2, matmul_dtype=jnp.bfloat16)
    assert pos2.shape == (C2, P)
    assert jnp.allclose(pos2, pr2, atol=1e-4, rtol=1e-4)
    assert jnp.allclose(lneg2.astype(jnp.float32), lr2, atol=1e-2, rtol=1e-2)
    assert jnp.allclose(rneg2.astype(jnp.float32), rr2, atol=1e-2, rtol=1e-2)

    print("KERNEL_OK")
</pallas_src>

<mosaic_0001>
module attributes {stable_mosaic.version = 11 : i64} {
  func.func @_biased_dot_kernel(%arg0: i32, %arg1: i32, %arg2: memref<2x8x33xf32, #tpu.memory_space<vmem>>, %arg3: memref<2x8x33xf32, #tpu.memory_space<vmem>>, %arg4: memref<2x19x33xf32, #tpu.memory_space<vmem>>, %arg5: memref<2x16x33xf32, #tpu.memory_space<vmem>>, %arg6: memref<2x1x8xf32, #tpu.memory_space<vmem>>, %arg7: memref<2x8x19xbf16, #tpu.memory_space<vmem>>, %arg8: memref<2x8x16xbf16, #tpu.memory_space<vmem>>) attributes {dimension_semantics = [#tpu.dimension_semantics<parallel>, #tpu.dimension_semantics<parallel>], iteration_bounds = array<i64: 2, 1>, scalar_prefetch = 0 : i64, scratch_operands = 0 : i64, tpu.core_type = #tpu.core_type<tc>, window_params = [{transform_indices = @transform_0, window_bounds = array<i64: 2, 8, 33>}, {transform_indices = @transform_1, window_bounds = array<i64: 2, 8, 33>}, {transform_indices = @transform_2, window_bounds = array<i64: 2, 19, 33>}, {transform_indices = @transform_3, window_bounds = array<i64: 2, 16, 33>}, {transform_indices = @transform_4, window_bounds = array<i64: 2, 1, 8>}, {transform_indices = @transform_5, window_bounds = array<i64: 2, 8, 19>}, {transform_indices = @transform_6, window_bounds = array<i64: 2, 8, 16>}]} {
    %c0 = arith.constant 0 : index
    %c0_0 = arith.constant 0 : index
    %c0_1 = arith.constant 0 : index
    %0 = vector.load %arg2[%c0, %c0_0, %c0_1] : memref<2x8x33xf32, #tpu.memory_space<vmem>>, vector<2x8x33xf32>
    %c0_2 = arith.constant 0 : index
    %c0_3 = arith.constant 0 : index
    %c0_4 = arith.constant 0 : index
    %1 = vector.load %arg3[%c0_2, %c0_3, %c0_4] : memref<2x8x33xf32, #tpu.memory_space<vmem>>, vector<2x8x33xf32>
    %c0_5 = arith.constant 0 : index
    %c0_6 = arith.constant 0 : index
    %c0_7 = arith.constant 0 : index
    %2 = vector.load %arg4[%c0_5, %c0_6, %c0_7] : memref<2x19x33xf32, #tpu.memory_space<vmem>>, vector<2x19x33xf32>
    %c0_8 = arith.constant 0 : index
    %c0_9 = arith.constant 0 : index
    %c0_10 = arith.constant 0 : index
    %3 = vector.load %arg5[%c0_8, %c0_9, %c0_10] : memref<2x16x33xf32, #tpu.memory_space<vmem>>, vector<2x16x33xf32>
    %4 = tpu.iota {dimensions = array<i32: 2>} : vector<1x1x33xi32>
    %c0_i32 = arith.constant 0 : i32
    %5 = vector.broadcast %c0_i32 : i32 to vector<1x1x33xi32>
    %6 = arith.cmpi ne, %4, %5 : vector<1x1x33xi32>
    %7 = arith.extui %6 : vector<1x1x33xi1> to vector<1x1x33xi32>
    %8 = arith.sitofp %7 : vector<1x1x33xi32> to vector<1x1x33xf32>
    %9 = vector.broadcast %8 : vector<1x1x33xf32> to vector<2x8x33xf32>
    %10 = arith.mulf %0, %9 : vector<2x8x33xf32>
    %11 = vector.broadcast %8 : vector<1x1x33xf32> to vector<2x8x33xf32>
    %12 = arith.mulf %1, %11 : vector<2x8x33xf32>
    %13 = vector.extract_strided_slice %0 {offsets = [0, 0, 0], sizes = [2, 8, 1], strides = [1, 1, 1]} : vector<2x8x33xf32> to vector<2x8x1xf32>
    %14 = vector.shape_cast %13 : vector<2x8x1xf32> to vector<2x8xf32>
    %15 = vector.extract_strided_slice %1 {offsets = [0, 0, 0], sizes = [2, 8, 1], strides = [1, 1, 1]} : vector<2x8x33xf32> to vector<2x8x1xf32>
    %16 = vector.shape_cast %15 : vector<2x8x1xf32> to vector<2x8xf32>
    %17 = vector.extract_strided_slice %2 {offsets = [0, 0, 0], sizes = [2, 19, 1], strides = [1, 1, 1]} : vector<2x19x33xf32> to vector<2x19x1xf32>
    %18 = vector.shape_cast %17 : vector<2x19x1xf32> to vector<2x19xf32>
    %19 = vector.extract_strided_slice %3 {offsets = [0, 0, 0], sizes = [2, 16, 1], strides = [1, 1, 1]} : vector<2x16x33xf32> to vector<2x16x1xf32>
    %20 = vector.shape_cast %19 : vector<2x16x1xf32> to vector<2x16xf32>
    %21 = arith.mulf %10, %12 : vector<2x8x33xf32>
    %cst = arith.constant dense<0.000000e+00> : vector<2x8xf32>
    %22 = vector.multi_reduction <add>, %21, %cst [2] : vector<2x8x33xf32> to vector<2x8xf32>
    %23 = arith.addf %22, %14 : vector<2x8xf32>
    %24 = arith.addf %23, %16 : vector<2x8xf32>
    %25 = vector.shape_cast %24 : vector<2x8xf32> to vector<2x1x8xf32>
    %c0_11 = arith.constant 0 : index
    %c0_12 = arith.constant 0 : index
    %c0_13 = arith.constant 0 : index
    %26 = vector.load %arg6[%c0_11, %c0_12, %c0_13] : memref<2x1x8xf32, #tpu.memory_space<vmem>>, vector<2x1x8xf32>
    tpu.vector_store %arg6[%c0_11, %c0_12, %c0_13], %25 {strides = array<i32>} : memref<2x1x8xf32, #tpu.memory_space<vmem>>, vector<2x1x8xf32>,
    %27 = arith.truncf %12 : vector<2x8x33xf32> to vector<2x8x33xbf16>
    %28 = arith.truncf %2 : vector<2x19x33xf32> to vector<2x19x33xbf16>
    %cst_14 = arith.constant dense<0.000000e+00> : vector<2x8x19xf32>
    %29 = tpu.matmul %27, %28, %cst_14 {dimension_numbers = #tpu.dot_dimension_numbers<[2], [2], [1], [1], [0, 0, 0, 1, 1, 1], [0], [0]>} : vector<2x8x33xbf16>, vector<2x19x33xbf16>, vector<2x8x19xf32> -> vector<2x8x19xf32>
    %30 = vector.shape_cast %16 : vector<2x8xf32> to vector<2x8x1xf32>
    %31 = vector.broadcast %30 : vector<2x8x1xf32> to vector<2x8x19xf32>
    %32 = arith.addf %29, %31 : vector<2x8x19xf32>
    %33 = vector.shape_cast %18 : vector<2x19xf32> to vector<2x1x19xf32>
    %34 = vector.broadcast %33 : vector<2x1x19xf32> to vector<2x8x19xf32>
    %35 = arith.addf %32, %34 : vector<2x8x19xf32>
    %36 = arith.truncf %35 : vector<2x8x19xf32> to vector<2x8x19xbf16>
    %c0_15 = arith.constant 0 : index
    %c0_16 = arith.constant 0 : index
    %c0_17 = arith.constant 0 : index
    %37 = vector.load %arg7[%c0_15, %c0_16, %c0_17] : memref<2x8x19xbf16, #tpu.memory_space<vmem>>, vector<2x8x19xbf16>
    tpu.vector_store %arg7[%c0_15, %c0_16, %c0_17], %36 {strides = array<i32>} : memref<2x8x19xbf16, #tpu.memory_space<vmem>>, vector<2x8x19xbf16>,
    %38 = arith.truncf %10 : vector<2x8x33xf32> to vector<2x8x33xbf16>
    %39 = arith.truncf %3 : vector<2x16x33xf32> to vector<2x16x33xbf16>
    %cst_18 = arith.constant dense<0.000000e+00> : vector<2x8x16xf32>
    %40 = tpu.matmul %38, %39, %cst_18 {dimension_numbers = #tpu.dot_dimension_numbers<[2], [2], [1], [1], [0, 0, 0, 1, 1, 1], [0], [0]>} : vector<2x8x33xbf16>, vector<2x16x33xbf16>, vector<2x8x16xf32> -> vector<2x8x16xf32>
    %41 = vector.shape_cast %14 : vector<2x8xf32> to vector<2x8x1xf32>
    %42 = vector.broadcast %41 : vector<2x8x1xf32> to vector<2x8x16xf32>
    %43 = arith.addf %40, %42 : vector<2x8x16xf32>
    %44 = vector.shape_cast %20 : vector<2x16xf32> to vector<2x1x16xf32>
    %45 = vector.broadcast %44 : vector<2x1x16xf32> to vector<2x8x16xf32>
    %46 = arith.addf %43, %45 : vector<2x8x16xf32>
    %47 = arith.truncf %46 : vector<2x8x16xf32> to vector<2x8x16xbf16>
    %c0_19 = arith.constant 0 : index
    %c0_20 = arith.constant 0 : index
    %c0_21 = arith.constant 0 : index
    %48 = vector.load %arg8[%c0_19, %c0_20, %c0_21] : memref<2x8x16xbf16, #tpu.memory_space<vmem>>, vector<2x8x16xbf16>
    tpu.vector_store %arg8[%c0_19, %c0_20, %c0_21], %47 {strides = array<i32>} : memref<2x8x16xbf16, #tpu.memory_space<vmem>>, vector<2x8x16xbf16>,
    return
  }
  func.func @transform_0(%arg0: i32, %arg1: i32) -> (i32, i32, i32) {
    %c0_i32 = arith.constant 0 : i32
    %c0_i32_0 = arith.constant 0 : i32
    return %arg0, %arg1, %c0_i32 : i32, i32, i32
  }
  func.func @transform_1(%arg0: i32, %arg1: i32) -> (i32, i32, i32) {
    %c0_i32 = arith.constant 0 : i32
    %c0_i32_0 = arith.constant 0 : i32
    return %arg0, %arg1, %c0_i32 : i32, i32, i32
  }
  func.func @transform_2(%arg0: i32, %arg1: i32) -> (i32, i32, i32) {
    %c0_i32 = arith.constant 0 : i32
    %c0_i32_0 = arith.constant 0 : i32
    %c0_i32_1 = arith.constant 0 : i32
    return %arg0, %c0_i32, %c0_i32_0 : i32, i32, i32
  }
  func.func @transform_3(%arg0: i32, %arg1: i32) -> (i32, i32, i32) {
    %c0_i32 = arith.constant 0 : i32
    %c0_i32_0 = arith.constant 0 : i32
    %c0_i32_1 = arith.constant 0 : i32
    return %arg0, %c0_i32, %c0_i32_0 : i32, i32, i32
  }
  func.func @transform_4(%arg0: i32, %arg1: i32) -> (i32, i32, i32) {
    %c0_i32 = arith.constant 0 : i32
    %c0_i32_0 = arith.constant 0 : i32
    return %arg0, %c0_i32, %arg1 : i32, i32, i32
  }
  func.func @transform_5(%arg0: i32, %arg1: i32) -> (i32, i32, i32) {
    %c0_i32 = arith.constant 0 : i32
    %c0_i32_0 = arith.constant 0 : i32
    return %arg0, %arg1, %c0_i32 : i32, i32, i32
  }
  func.func @transform_6(%arg0: i32, %arg1: i32) -> (i32, i32, i32) {
    %c0_i32 = arith.constant 0 : i32
    %c0_i32_0 = arith.constant 0 : i32
    return %arg0, %arg1, %c0_i32 : i32, i32, i32
  }
}

</mosaic_0001>

<bundles_post_ra>
// kernel: tpu_custom_call.1
= control target key start
LH: loop header
LB: loop body
LE: loop exit
PB: predicated region body
PF: predicated region fallthrough
CT: control target
= control target key end

     0   :  { %s1489_s0 = inlined_call_operand.vmem [shape: f32[4,8,33], index: 0, kind: input, shape index: {}]   ;;  %s1490_s1 = inlined_call_operand.vmem [shape: f32[4,8,33], index: 1, kind: input, shape index: {}]   ;;  %s1491_s2 = inlined_call_operand.vmem [shape: f32[4,19,33], index: 2, kind: input, shape index: {}]   ;;  %s1492_s3 = inlined_call_operand.vmem [shape: f32[4,16,33], index: 3, kind: input, shape index: {}]   ;;  %s1493_s4 = inlined_call_operand.hbm [shape: f32[4,1,8], index: 4, kind: output, shape index: {0}]   ;;  %s1494_s5 = inlined_call_operand.hbm [shape: bf16[4,8,19], index: 5, kind: output, shape index: {1}]   ;;  %s1495_s6 = inlined_call_operand.hbm [shape: bf16[4,8,16], index: 6, kind: output, shape index: {2}]  }
   0x1   :  { %1502 = sst [smem:[#allocation9_spill]] %s1489_s0 }
   0x2   :  { %12 = vsyncpa [#allocation3], 0 }
   0x3   :  { %14 = vsyncpa [#allocation3 + $0x1], 0 }
   0x4   :  { %15 = vsyncpa [#allocation5], 0 }
   0x5   :  { %17 = vsyncpa [#allocation5 + $0x1], 0  ;;  %s1220_s21 = smov 0   ;;  %s1222_s22 = smov 0  }
   0x6   :  { %s1224_s23 = smov 0   ;;  %s1226_s24 = smov 0  }
   0x7   :  { %s1228_s25 = smov 0   ;;  %s1230_s26 = smov 0  }
   0x8 LB: > { %s1497_s27 = sadd.s32 4294967295, %s1177_s26   ;;  %s1496_s28 = sadd.s32 4294967294, %s1177_s26   ;;  %s1177_s26 = sphi %s1230_s26, %s23_s26   ;;  %s1173_s25 = sphi %s1228_s25, %s1518_s25   ;;  %s1169_s24 = sphi %s1226_s24, %s1517_s24   ;;  %s1165_s23 = sphi %s1224_s23, %s1516_s23   ;;  %s1161_s22 = sphi %s1222_s22, %s1515_s22   ;;  %s1157_s21 = sphi %s1220_s21, %s1514_s21  }
   0x9   : > { %s35_s29 = sadd.s32 1, %s1173_s25  ;;  %s152_s30 = sadd.s32 1, %s1165_s23 }
   0xa   : > { %p37_p0 = scmp.ge.s32.totalorder %s35_s29, 2  ;;  %p162_p1 = scmp.ne.s32.totalorder %s1165_s23, %s1161_s22 }
   0xb   : > { %p163_p2 = scmp.eq.s32.totalorder %s1497_s27, 1  ;;  %p168_p3 = scmp.ne.s32.totalorder %s1161_s22, %s1157_s21 }
   0xc   : > { %s1520_s29 = smov (%p37_p0, %s35_s29), 0  ;;  %p169_p5 = scmp.eq.s32.totalorder %s1496_s28, 1 }
   0xd   : > { %p1262_p4 = por %p163_p2, %p162_p1  ;;  %s147_s8 = ssub.s32 %s1173_s25, %s1520_s29 }
   0xe   : > { %p933_p6 = scmp.ge.s32.totalorder %s1177_s26, 1  ;;  %p150_p7 = scmp.eq.s32.totalorder %s147_s8, 0 }
   0xf   : > { %p1271_p8 = por %p169_p5, %p168_p3  ;;  %p287_p9 = scmp.lt.s32.totalorder %s1177_s26, 3 }
  0x10   : > { %s1277_s10 = scalar_select %p150_p7, %s1165_s23, %s152_s30  }
  0x11   : > { %p288_p10 = pnand %p933_p6, %p287_p9 }
  0x12   : > { %s1280_s11 = sshll.u32 (!%p288_p10), %s1169_s24, 1  ;;  %s1505_s0 = sld [smem:[#allocation9_spill]] (!%p288_p10) }
  0x13   : > { %291 = sbr.rel (%p288_p10) target bundleno = 301 (0x12d), region = 36  ;;  %p351_p11 = scmp.lt.s32.totalorder (!%p288_p10), %s1280_s11, 3 }
  0x14   : > { %s1506_s19 = sadd.s32 (!%p288_p10), 4294967295, %s1177_s26  }
  0x18   : > { %v400_v0 = vlaneseq  ;;  %v1179_v1 = vmov 0   ;;  %s352_s12 = scalar_select %p351_p11, %s1280_s11, 3  ;;  %v1180_v3 = vmov 0.0   ;;  %vm411_vm1 = vcmask 269312  }
  0x19   : > { %1038 = vset.pattern.permute.xlu1 %v1179_v1  ;;  %1036 = vset.pattern.permute.xlu2 %v1179_v1  ;;  %vm542_vm2 = vcmask 130112   ;;  %vm546_vm3 = vcmask 195712   ;;  %vm577_vm4 = vcmask 150528  }
  0x1a   : > { %v1283_v2 = vand.u32 127, %v400_v0  ;;  %1037 = vset.pattern.permute.xlu0 %v1179_v1  ;;  %s938_s13 = sshll.u32 %s352_s12, 3  ;;  %s964_s14 = smul.u32 24, %s352_s12 }
  0x1b   : > { %s357_s17 = scalar_lea.vmem %s1505_s0, %s938_s13  ;;  %s366_s20 = scalar_lea.vmem %s1490_s1, %s938_s13 }
  0x1c   : > { %vm402_vm0 = vcmp.ne.s32.totalorder %v1283_v2, 0  ;;  %v1293_v5 = vld [vmem:[%s357_s17] sm:$0xff]  ;;  %v1297_v7 = vld [vmem:[%s357_s17 + $0x8] sm:$0xff]  ;;  %s373_s28 = scalar_lea.vmem %s1491_s2, %s964_s14  ;;  %s961_s27 = sshll.u32 %s352_s12, 4 }
  0x1d   : > { %v946_v4 = vsel %vm402_vm0, 1.0, %v1180_v3  ;;  %v1295_v6 = vld [vmem:[%s366_s20] sm:$0xff]  ;;  %v1308_v10 = vld [vmem:[%s366_s20 + $0x8] sm:$0xff]  ;;  %v392_v11 = vld [vmem:[%s373_s28 + $0x10] sm:$0x7]  ;;  %s1313_s16 = scalar_lea.vmem %s1492_s3, %s961_s27  ;;  %s1369_s27 = sand.u32 1, %s1161_s22  }
  0x1e   : > { %v1303_v8 = vmul.f32 %v946_v4, %v1293_v5  ;;  %v1306_v9 = vmul.f32 %v946_v4, %v1295_v6  ;;  %v395_v12 = vld [vmem:[%s373_s28 + $0x28] sm:$0x7]  ;;  %447 = vperm.xlu2 %1036, %v1295_v6   ;;  %v1317_v13 = vmul.f32 %v946_v4, %v1297_v7  ;;  %v1320_v14 = vmul.f32 %v946_v4, %v1308_v10  ;;  %v1323_v18 = vld [vmem:[%s1313_s16] sm:$0xff]  ;;  %v393_v28 = vld [vmem:[%s373_s28 + $0x18] sm:$0xff]  ;;  %s1499_s12 = sshll.u32 %s1369_s27, 3  ;;  %s1386_s20 = sand.u32 1, %s1506_s19  }
  0x1f   : > { %v441_v15 = vpack.c.bf16 %v392_v11, %v392_v11  ;;  %v444_v16 = vpack.c.bf16 %v395_v12, %v395_v12  ;;  %v391_v17 = vld [vmem:[%s373_s28 + $0x8] sm:$0xff]  ;;  %v582_v22 = vpack.c.bf16 %v1323_v18, %v1323_v18  ;;  %v390_v24 = vld [vmem:[%s373_s28] sm:$0xff]  ;;  %v442_v39 = vpack.c.bf16 %v393_v28, %v393_v28  ;;  %v398_v41 = vld [vmem:[%s1313_s16 + $0x10] sm:$0xff]  ;;  %s342_s30 = scalar_lea.vmem [#allocation4], %s1499_s12  ;;  %s1059_s19 = scalar_lea.hbm %s1494_s5, 16 }
  0x20   : > { %v397_v19 = vld [vmem:[%s1313_s16 + $0x8] sm:$0xff]  ;;  %v409_v20 = vmul.f32 %v1306_v9, %v1303_v8  ;;  %525 = vperm.xlu1 %1038, %v391_v17   ;;  %v440_v21 = vpack.c.bf16 %v391_v17, %v391_v17  ;;  %v439_v27 = vpack.c.bf16 %v390_v24, %v390_v24  ;;  %v394_v29 = vld [vmem:[%s373_s28 + $0x20] sm:$0xff]  ;;  %v410_v37 = vmul.f32 %v1320_v14, %v1317_v13  ;;  %v399_v42 = vld [vmem:[%s1313_s16 + $0x18] sm:$0xff]  ;;  %s1498_s28 = sshll.u32 %s1169_s24, 3  ;;  %s728_s8 = sshll.u32 %s342_s30, 4  ;;  %s1394_s8 = int_to_ptr.vmem [resolvable:$true] %s728_s8 }
  0x21   : > { %v583_v23 = vpack.c.bf16 %v397_v19, %v397_v19  ;;  %v460_v25 = vunpack.c.l.b16 %v441_v15  ;;  %v490_v26 = vunpack.c.l.b16 %v444_v16  ;;  %v598_v31 = vunpack.c.l.b16 %v582_v22  ;;  %s727_s18 = scalar_lea.hbm %s1494_s5, %s1498_s28 }
  0x22   : > { %v412_v30 = vsel %vm411_vm1, %v409_v20, 0.0  ;;  %v459_v35 = vunpack.c.l.b16 %v440_v21  ;;  %v458_v36 = vunpack.c.l.b16 %v439_v27  ;;  %v443_v40 = vpack.c.bf16 %v394_v29, %v394_v29  ;;  %s730_s13 = sshll.u32 %s727_s18, 4  ;;  %s731_s13 = int_to_ptr.hbm [resolvable:$true] %s730_s13 }
  0x23   : > { %v599_v32 = vunpack.c.l.b16 %v583_v23  ;;  %413 = vadd.xlane.f32.xlu0 %v412_v30  ;;  %v462_v33 = vpack.c.b16 %v460_v25, %v460_v25  ;;  %v492_v34 = vpack.c.b16 %v490_v26, %v490_v26  ;;  %v488_v46 = vunpack.c.l.b16 %v442_v39  ;;  %s1053_s16 = sshra.s32 %s731_s13, 4  ;;  %s1054_s16 = int_to_ptr.hbm [resolvable:$true] %s1053_s16 }
  0x24   : > { %v489_v47 = vunpack.c.l.b16 %v443_v40  ;;  %v461_v48 = vpack.c.b16 %v459_v35, %v458_v36  ;;  %v584_v49 = vpack.c.bf16 %v398_v41, %v398_v41  ;;  %v585_v50 = vpack.c.bf16 %v399_v42, %v399_v42  ;;  %s1055_s14 = scalar_lea.hbm %s1054_s16, 8  ;;  %p1060_p1 = scmp.lt.s32.totalorder %s1054_s16, %s1494_s5 }
  0x25   : > { %v600_v38 = vpack.c.b16 %v599_v32, %v598_v31  ;;  %v470_v43 = vsel %vm411_vm1, %v462_v33, 0  ;;  %v500_v44 = vsel %vm411_vm1, %v492_v34, 0  ;;  %v415_v51 = vsel %vm411_vm1, %v410_v37, 0.0  ;;  %p1056_p12 = scmp.ne.s32.totalorder %s1054_s16, %s1055_s14  ;;  %p1061_p2 = scmp.lt.s32.totalorder %s1059_s19, %s1055_s14 }
  0x26   : > { %478 = vmatpush.bf16.xpose.msra.mxu0 %v470_v43  ;;  %508 = vmatpush.bf16.xpose.msra.mxu1 %v500_v44  ;;  %v491_v52 = vpack.c.b16 %v489_v47, %v488_v46  ;;  %v622_v53 = vunpack.c.l.b16 %v584_v49  ;;  %v623_v54 = vunpack.c.l.b16 %v585_v50  ;;  %v467_v55 = vsel %vm411_vm1, %v461_v48, 0 }
  0x27   : > { %v605_v45 = vsel %vm411_vm1, %v600_v38, 0  ;;  %452 = vperm.xlu2 %1036, %v1308_v10   ;;  %v580_v57 = vpack.c.bf16 %v1303_v8, %v1303_v8  ;;  %v437_v60 = vpack.c.bf16 %v1306_v9, %v1306_v9  ;;  %v438_v61 = vpack.c.bf16 %v1320_v14, %v1320_v14  ;;  %p1057_p13 = pnand %p1056_p12, %p1262_p4  ;;  %p1062_p3 = por %p1061_p2, %p1060_p1 }
  0x28   : > { %614 = vmatpush.bf16.xpose.msra.mxu2 %v605_v45  ;;  %531 = vperm.xlu1 %1038, %v393_v28   ;;  %v497_v56 = vsel %vm411_vm1, %v491_v52, 0  ;;  %v624_v58 = vpack.c.b16 %v623_v54, %v622_v53  ;;  %v581_v62 = vpack.c.bf16 %v1317_v13, %v1317_v13  ;;  %v1363_v16 = vadd.s32 4294967288, %v1283_v2 }
  0x29   : > { %v544_v17 = vadd.s32 4294967280, %v1283_v2  ;;  %p1058_p0 = pneg %p1057_p13 }
  0x2a   : > { %v629_v59 = vsel %vm411_vm1, %v624_v58, 0 }
  0x2b   : > { %416 = vadd.xlane.f32.xlu0 %v415_v51  ;;  %638 = vmatpush.bf16.xpose.msra.mxu3 %v629_v59  ;;  %p1063_p5 = pnand %p1062_p3, %p1058_p0 }
  0x2e   : > { %479 = vmatpush.bf16.xpose.msra.mxu0 %v467_v55  ;;  %509 = vmatpush.bf16.xpose.msra.mxu1 %v497_v56 }
  0x2f   : > { %949 = vmatmul.msk.bf16.vlgmr.msra.gmra.mxu2 %vm411_vm1, %v580_v57  ;;  %528 = vperm.xlu2 %1036, %v392_v11  }
  0x30   : > { %537 = vperm.xlu1 %1038, %v395_v12  }
  0x32   : > { %950 = vmatmul.msk.bf16.vlgmr.msra.gmra.mxu3 %vm411_vm1, %v581_v62 }
  0x35   : > { %947 = vmatmul.msk.bf16.vlgmr.msra.gmra.mxu0 %vm411_vm1, %v437_v60  ;;  %948 = vmatmul.msk.bf16.vlgmr.msra.gmra.mxu1 %vm411_vm1, %v438_v61 }
  0x37   : > { %534 = vperm.xlu2 %1036, %v394_v29  }
  0x38   : > { %652 = vperm.xlu1 %1038, %v397_v19  }
  0x3f   : > { %522 = vperm.xlu0 %1037, %v390_v24   ;;  %649 = vperm.xlu2 %1036, %v1323_v18  }
  0x47   : > { %655 = vperm.xlu2 %1036, %v398_v41   ;;  %593 = vperm.xlu0 %1037, %v1297_v7  }
  0x4f   : > { %588 = vperm.xlu2 %1036, %v1293_v5  }
  0x78   : > { %v448_v63 = vpop.permute.xlu2 %447 }
  0x81   : > { %v453_v0 = vpop.permute.xlu2 %452 }
  0x89   : > { %v529_v9 = vpop.permute.xlu2 %528 }
  0x8a   : > { %v545_v21 = vperm.slane %v529_v9, %v544_v17 }
  0x91   : > { %v535_v15 = vpop.permute.xlu2 %534 }
  0x92   : > { %v526_v3 = vpop.permute.xlu1 %525 }
  0x93   : > { %v541_v20 = vperm.slane %v526_v3, %v1363_v16 }
  0x96   : > { %v414_v1 = vpop.xlane.xlu0 %413 }
  0x97   : > { %v418_v4 = vadd.f32 %v414_v1, %v1293_v5 }
  0x99   : > { %v420_v8 = vadd.f32 %v418_v4, %v1295_v6  ;;  %v549_v6 = vperm.slane %v535_v15, %v1363_v16  ;;  %v650_v19 = vpop.permute.xlu2 %649 }
  0x9a   : > { %v532_v13 = vpop.permute.xlu1 %531  ;;  %v660_v36 = vperm.slane %v650_v19, %v1283_v2 }
  0x9b   : > { %425 = vperm.xlu1 %1038, %v420_v8   ;;  %v548_v18 = vperm.slane %v532_v13, %v1283_v2 }
  0x9e   : > { %v417_v11 = vpop.xlane.xlu0 %416 }
  0x9f   : > { %v419_v12 = vadd.f32 %v417_v11, %v1297_v7 }
  0xa1   : > { %v421_v14 = vadd.f32 %v419_v12, %v1308_v10  ;;  %v550_v10 = vsel %vm542_vm2, %v549_v6, %v548_v18  ;;  %v1382_v27 = vpop.permute.xlu2 %655 }
  0xa2   : > { %v538_v5 = vpop.permute.xlu1 %537 }
  0xa3   : > { %428 = vperm.xlu1 %1038, %v421_v14   ;;  %v551_v7 = vperm.slane %v538_v5, %v544_v17 }
  0xa5   : > { %v552_v26 = vsel %vm546_vm3, %v551_v7, %v550_v10 }
  0xaa   : > { %v653_v32 = vpop.permute.xlu1 %652 }
  0xab   : > { %658 = vperm.xlu1 %1038, %v399_v42   ;;  %v661_v37 = vperm.slane %v653_v32, %v1363_v16  ;;  %v589_v42 = vpop.permute.xlu2 %588 }
  0xad   : > { %v662_v43 = vsel %vm542_vm2, %v661_v37, %v660_v36 }
  0xb1   : > { %v523_v22 = vpop.permute.xlu0 %522 }
  0xb2   : > { %v539_v23 = vperm.slane %v523_v22, %v1283_v2  ;;  %v481_v24 = vpop.f32.mrf.mxu0  ;;  %v511_v25 = vpop.f32.mrf.mxu1 }
  0xb3   : > { %v482_v28 = vadd.f32 %v481_v24, %v448_v63  ;;  %v512_v29 = vadd.f32 %v511_v25, %v453_v0  ;;  %v616_v30 = vpop.f32.mrf.mxu2 }
  0xb4   : > { %v543_v31 = vsel %vm542_vm2, %v541_v20, %v539_v23 }
  0xb5   : > { %v547_v33 = vsel %vm546_vm3, %v545_v21, %v543_v31  ;;  %v574_v34 = vadd.f32 %v552_v26, %v512_v29 }
  0xb6   : > { %v573_v35 = vadd.f32 %v547_v33, %v482_v28 }
  0xb7   : > { %v576_v38 = vpack.c.bf16 %v574_v34, %v574_v34 }
  0xb8   : > { %v575_v39 = vpack.c.bf16 %v573_v35, %v573_v35 }
  0xb9   : > { %579 = vst.msk [vmem:[%s342_s30 + $0x4] sm:$0xf] %vm577_vm4, %v576_v38 }
  0xba   : > { %578 = vst.msk [vmem:[%s342_s30] sm:$0xf] %vm577_vm4, %v575_v39  ;;  %v483_v40 = vpop.f32.mrf.mxu0  ;;  %v513_v41 = vpop.f32.mrf.mxu1 }
  0xbb   : > { %v618_v44 = vpop.f32.mrf.mxu2 }
  0xbc   : > { %1066 = shalt.err (!%p1063_p5)
}
  0xbd   : > { %s1500_s12 = smov 64   ;;  %s1501_s15 = smov 4   ;;  %v617_v45 = vadd.f32 %v616_v30, %v589_v42  ;;  %vm684_vm5 = vcmask 125952   ;;  %v640_v48 = vpop.f32.mrf.mxu3  ;;  %vm434_vm6 = vcmask 57344  }
  0xbe   : > { %s1507_s17 = scalar_lea.sflag [#allocation5], %s1386_s20  ;;  %s1508_s28 = sshll.u32 %s1369_s27, 3 }
  0xbf   : > { %966 = dma.vmem_to_hbm [thread:$0]  (%p1262_p4), %s1394_s8, 128, %s731_s13, %s1507_s17, %s1500_s12, %s1500_s12, %s1501_s15   ;;  %v680_v46 = vadd.f32 %v662_v43, %v617_v45 }
  0xc0   : > { %s1416_s16 = scalar_lea.vmem [#allocation6], %s1508_s28  ;;  %s934_s14 = sshll.u32 %s1369_s27, 1 }
  0xc1   : > { %v682_v47 = vpack.c.bf16 %v680_v46, %v680_v46  ;;  %s709_s13 = scalar_lea.hbm %s1493_s4, %s1280_s11  ;;  %s335_s19 = scalar_lea.vmem [#allocation2], %s934_s14 }
  0xc2   : > { %s710_s30 = sshll.u32 %s335_s19, 4  ;;  %s712_s17 = sshll.u32 %s709_s13, 4  ;;  %s711_s30 = int_to_ptr.vmem [resolvable:$true] %s710_s30  ;;  %s713_s17 = int_to_ptr.hbm [resolvable:$true] %s712_s17 }
  0xc3   : > { %685 = vst.msk [vmem:[%s1416_s16] sm:$0xf] %vm684_vm5, %v682_v47  ;;  %s688_s28 = scalar_lea.sflag [#allocation3], %s1369_s27  ;;  %s1081_s12 = sshra.s32 %s713_s17, 4  ;;  %s1082_s12 = int_to_ptr.hbm [resolvable:$true] %s1081_s12 }
  0xc4   : > { %s1083_s15 = scalar_lea.hbm %s1082_s12, 2  ;;  %s1087_s14 = scalar_lea.hbm %s1493_s4, 4 }
  0xc5   : > { %v642_v49 = vpop.f32.mrf.mxu3  ;;  %p1084_p6 = scmp.ne.s32.totalorder %s1082_s12, %s1083_s15  ;;  %p1088_p10 = scmp.lt.s32.totalorder %s1082_s12, %s1493_s4 }
  0xc6   : > { %p1089_p11 = scmp.lt.s32.totalorder %s1087_s14, %s1083_s15 }
  0xc7   : > { %p1085_p7 = pnand %p1084_p6, %p1262_p4 }
  0xc8   : > { %p1090_p12 = por %p1089_p11, %p1088_p10 }
  0xc9   : > { %p1086_p9 = pneg %p1085_p7 }
  0xcb   : > { %p1091_p13 = pnand %p1090_p12, %p1086_p9 }
 0x10d   : > { %v426_v50 = vpop.permute.xlu1 %425 }
 0x10e   : > { %v430_v51 = vperm.slane %v426_v50, %v1283_v2 }
 0x110   : > { %435 = vst.msk [vmem:[%s335_s19] sm:$0x1] %vm434_vm6, %v430_v51 }
 0x115   : > { %v429_v52 = vpop.permute.xlu1 %428 }
 0x116   : > { %v431_v53 = vperm.slane %v429_v52, %v1283_v2 }
 0x118   : > { %436 = vst.msk [vmem:[%s335_s19 + $0x1] sm:$0x1] %vm434_vm6, %v431_v53 }
 0x119   : > { %1094 = shalt.err (!%p1091_p13)
}
 0x11a   : > { %s1183_s27 = smov 16   ;;  %s1184_s19 = smov 1   ;;  %v594_v54 = vpop.permute.xlu0 %593  ;;  %v663_v56 = vperm.slane %v1382_v27, %v1283_v2 }
 0x11b   : > { %965 = dma.vmem_to_hbm [thread:$0]  (%p1262_p4), %s711_s30, 32, %s713_s17, %s688_s28, %s1183_s27, %s1183_s27, %s1184_s19   ;;  %v641_v58 = vadd.f32 %v640_v48, %v594_v54 }
 0x11c   : > { %s1509_s18 = sshll.u32 %s1169_s24, 3  ;;  %s746_s12 = sshll.u32 %s1416_s16, 4  ;;  %s747_s12 = int_to_ptr.vmem [resolvable:$true] %s746_s12 }
 0x11d   : > { %v659_v55 = vpop.permute.xlu1 %658  ;;  %s745_s8 = scalar_lea.hbm %s1495_s6, %s1509_s18  ;;  %s1115_s28 = scalar_lea.hbm %s1495_s6, 16 }
 0x11e   : > { %v664_v57 = vperm.slane %v659_v55, %v1363_v16  ;;  %s748_s15 = sshll.u32 %s745_s8, 4  ;;  %s749_s15 = int_to_ptr.hbm [resolvable:$true] %s748_s15 }
 0x11f   : > { %s1109_s24 = sshra.s32 %s749_s15, 4  ;;  %s1110_s24 = int_to_ptr.hbm [resolvable:$true] %s1109_s24 }
 0x120   : > { %v665_v59 = vsel %vm542_vm2, %v664_v57, %v663_v56  ;;  %s1111_s0 = scalar_lea.hbm %s1110_s24, 8  ;;  %p1116_p3 = scmp.lt.s32.totalorder %s1110_s24, %s1495_s6 }
 0x121   : > { %v681_v60 = vadd.f32 %v665_v59, %v641_v58  ;;  %p1112_p0 = scmp.ne.s32.totalorder %s1110_s24, %s1111_s0  ;;  %p1117_p5 = scmp.lt.s32.totalorder %s1115_s28, %s1111_s0 }
 0x123   : > { %v683_v61 = vpack.c.bf16 %v681_v60, %v681_v60  ;;  %p1113_p1 = pnand %p1112_p0, %p1262_p4  ;;  %p1118_p6 = por %p1117_p5, %p1116_p3 }
 0x125   : > { %686 = vst.msk [vmem:[%s1416_s16 + $0x4] sm:$0xf] %vm684_vm5, %v683_v61  ;;  %p1114_p2 = pneg %p1113_p1 }
 0x127   : > { %p1119_p7 = pnand %p1118_p6, %p1114_p2 }
 0x129   : > { %1122 = shalt.err (!%p1119_p7)
}
 0x12a   : > { %s1510_s16 = smov 4   ;;  %s1511_s27 = smov 64  }
 0x12b   : > { %s1512_s19 = scalar_lea.sflag [#allocation5], %s1386_s20 }
 0x12c   : > { %967 = dma.vmem_to_hbm [thread:$0]  (%p1262_p4), %s747_s12, 128, %s749_s15, %s1512_s19, %s1511_s27, %s1511_s27, %s1510_s16  }
 0x12d PF: > { %p981_p9 = scmp.ge.s32.totalorder %s1177_s26, 2  ;;  %s763_s18 = sand.u32 1, %s1157_s21  }
 0x12e   : > { %s764_s11 = scalar_lea.sflag [#allocation3], %s763_s18 }
 0x12f   : > { %p972_p10 = pnand %p981_p9, %p1271_p8 }
 0x131   : > { %p973_p11 = pneg %p972_p10 }
 0x133   : > { %1148 = dma.done.wait (%p973_p11), %s764_s11, 32  }
 0x134   : > { %1150 = vsyncadd (%p973_p11), %s764_s11, 4294967264  ;;  %s1513_s7 = sadd.s32 4294967294, %s1177_s26  }
 0x135   : > { %s773_s8 = sand.u32 1, %s1513_s7  }
 0x136   : > { %s774_s24 = scalar_lea.sflag [#allocation5], %s773_s8 }
 0x137   : > { %1152 = dma.done.wait (%p973_p11), %s774_s24, 256  }
 0x138   : > { %1154 = vsyncadd (%p973_p11), %s774_s24, 4294967040  ;;  %s23_s26 = sadd.s32 1, %s1177_s26   ;;  %s1514_s21 = smov %s1161_s22 }
 0x139   : > { %p20_p4 = scmp.ge.s32.totalorder %s23_s26, 4   ;;  %s1515_s22 = smov %s1165_s23 }
 0x13a   : > { %s1516_s23 = smov %s1277_s10  ;;  %s1517_s24 = smov %s1173_s25 }
 0x13b   : > { %s1518_s25 = smov %s1520_s29  ;;  %22 = sbr.rel (!%p20_p4) target bundleno = 8 (0x8), region = 112 }
 0x140   :  { %790 = vsyncpa [#allocation3], 1 }
 0x141   :  { %792 = vsyncpa [#allocation3 + $0x1], 1 }
 0x142   :  { %793 = vsyncpa [#allocation5], 1 }
 0x143   :  { %795 = vsyncpa [#allocation5 + $0x1], 1 }

</bundles_post_ra>
